<compile_context>
chip_gen: v7x
topology: tpu7x:2x2x1
jax: 0.10.0
libtpu: 0.0.40
codegen_flags: <defaults>
</compile_context>

<pallas_src>
import jax
import jax.numpy as jnp
from jax.experimental import pallas as pl
from jax.experimental.pallas import tpu as pltpu


_CB_CAP = 2048  # rows per block (multiple of 8); bounds VMEM footprint for large N*C.


def _scale_mul_kernel(x_ref, s_ref, o_ref):
    # x_ref: (cb, HW), s_ref: (cb, 1) -> broadcast along the lane (HW) axis.
    o_ref[...] = x_ref[...] * s_ref[...]


def _num_tensorcores_per_chip() -> int:
    """Best-effort TensorCore count per chip; defaults to 1 on any uncertainty."""
    try:
        info = pltpu.get_tpu_info()
    except Exception:
        return 1
    for attr in ("num_cores", "num_tensorcores", "tensorcores_per_chip",
                 "cores_per_chip", "core_count"):
        v = getattr(info, attr, None)
        if isinstance(v, int) and v >= 1:
            return v
    return 1


def channel_scale_mul(x_nchw: jax.Array, s_nc11: jax.Array) -> jax.Array:
    """Computes x_nchw * s_nc11 (broadcast over H, W) via a Pallas TPU kernel."""
    n, c, h, w = x_nchw.shape
    assert s_nc11.shape == (n, c, 1, 1)
    assert s_nc11.dtype == x_nchw.dtype

    nc = n * c
    hw = h * w

    # Contiguous (free) views: NCHW -> (N*C, H*W), (N,C,1,1) -> (N*C, 1).
    x2d = x_nchw.reshape(nc, hw)
    s2d = s_nc11.reshape(nc, 1)

    n_tc = _num_tensorcores_per_chip()

    # Block rows: whole slab by default (grid=(1,) on single-TC chips); split across
    # TensorCores only when the chip has more than one and the split stays 8-aligned;
    # always cap so VMEM stays bounded for large N*C.
    cb = nc
    if n_tc > 1 and nc % (8 * n_tc) == 0:
        cb = nc // n_tc
    if cb > _CB_CAP:
        cb = _CB_CAP
    if cb != nc and cb % 8 != 0:
        cb = max(8, (cb // 8) * 8)
    grid = (pl.cdiv(nc, cb),)

    dtype_bytes = jnp.dtype(x_nchw.dtype).itemsize
    cost = pl.CostEstimate(
        flops=nc * hw,
        transcendentals=0,
        bytes_accessed=(2 * nc * hw + nc) * dtype_bytes,
    )

    def _call(dim_semantics):
        return pl.pallas_call(
            _scale_mul_kernel,
            out_shape=jax.ShapeDtypeStruct((nc, hw), x_nchw.dtype),
            grid=grid,
            in_specs=[
                pl.BlockSpec((cb, hw), lambda i: (i, 0)),
                pl.BlockSpec((cb, 1), lambda i: (i, 0)),
            ],
            out_specs=pl.BlockSpec((cb, hw), lambda i: (i, 0)),
            compiler_params=pltpu.CompilerParams(dimension_semantics=dim_semantics),
            cost_estimate=cost,
        )(x2d, s2d)

    # On a multi-TensorCore chip (v7x) with an exact per-core split, request a true
    # cross-core shard (plain "parallel" vs "arbitrary" is codegen-neutral); fall back
    # to the known-safe "parallel" path if CORE_PARALLEL is rejected.
    if n_tc > 1 and grid[0] == n_tc:
        try:
            out2d = _call((pltpu.CORE_PARALLEL,))
        except Exception:
            out2d = _call(("parallel",))
    else:
        out2d = _call(("parallel",))

    return out2d.reshape(n, c, h, w)


if __name__ == "__main__":
    key = jax.random.PRNGKey(0)
    k1, k2 = jax.random.split(key)

    # Small shapes consistent with the module (original: [1, 1632, 7, 7] * [1, 1632, 1, 1]).
    x449 = jax.random.normal(k1, (2, 16, 7, 7), dtype=jnp.float32)
    x454 = jax.random.normal(k2, (2, 16, 1, 1), dtype=jnp.float32)

    out = channel_scale_mul(x449, x454)
    jax.block_until_ready(out)

    # Correctness check against plain-JAX broadcast multiply.
    ref = x449 * x454
    assert out.shape == x449.shape
    assert jnp.allclose(out, ref, atol=1e-6, rtol=1e-6)

    # bf16 path (what the surrounding EfficientNet typically runs in): halves HBM bytes.
    x_bf16 = x449.astype(jnp.bfloat16)
    s_bf16 = x454.astype(jnp.bfloat16)
    out_bf16 = channel_scale_mul(x_bf16, s_bf16)
    jax.block_until_ready(out_bf16)
    ref_bf16 = x_bf16 * s_bf16
    assert jnp.allclose(out_bf16.astype(jnp.float32), ref_bf16.astype(jnp.float32),
                        atol=1e-2, rtol=1e-2)

    print("KERNEL_OK")
</pallas_src>

<mosaic_0001>
module attributes {stable_mosaic.version = 11 : i64} {
  func.func @_scale_mul_kernel(%arg0: i32, %arg1: memref<32x49xf32, #tpu.memory_space<vmem>>, %arg2: memref<32x1xf32, #tpu.memory_space<vmem>>, %arg3: memref<32x49xf32, #tpu.memory_space<vmem>>) attributes {dimension_semantics = [#tpu.dimension_semantics<parallel>], iteration_bounds = array<i64: 1>, scalar_prefetch = 0 : i64, scratch_operands = 0 : i64, tpu.core_type = #tpu.core_type<tc>, window_params = [{transform_indices = @transform_0, window_bounds = array<i64: 32, 49>}, {transform_indices = @transform_1, window_bounds = array<i64: 32, 1>}, {transform_indices = @transform_2, window_bounds = array<i64: 32, 49>}]} {
    %c0 = arith.constant 0 : index
    %c0_0 = arith.constant 0 : index
    %0 = vector.load %arg1[%c0, %c0_0] : memref<32x49xf32, #tpu.memory_space<vmem>>, vector<32x49xf32>
    %c0_1 = arith.constant 0 : index
    %c0_2 = arith.constant 0 : index
    %1 = vector.load %arg2[%c0_1, %c0_2] : memref<32x1xf32, #tpu.memory_space<vmem>>, vector<32x1xf32>
    %2 = vector.broadcast %1 : vector<32x1xf32> to vector<32x49xf32>
    %3 = arith.mulf %0, %2 : vector<32x49xf32>
    %c0_3 = arith.constant 0 : index
    %c0_4 = arith.constant 0 : index
    %4 = vector.load %arg3[%c0_3, %c0_4] : memref<32x49xf32, #tpu.memory_space<vmem>>, vector<32x49xf32>
    tpu.vector_store %arg3[%c0_3, %c0_4], %3 {strides = array<i32>} : memref<32x49xf32, #tpu.memory_space<vmem>>, vector<32x49xf32>,
    return
  }
  func.func @transform_0(%arg0: i32) -> (i32, i32) {
    %c0_i32 = arith.constant 0 : i32
    %c0_i32_0 = arith.constant 0 : i32
    return %arg0, %c0_i32 : i32, i32
  }
  func.func @transform_1(%arg0: i32) -> (i32, i32) {
    %c0_i32 = arith.constant 0 : i32
    %c0_i32_0 = arith.constant 0 : i32
    return %arg0, %c0_i32 : i32, i32
  }
  func.func @transform_2(%arg0: i32) -> (i32, i32) {
    %c0_i32 = arith.constant 0 : i32
    %c0_i32_0 = arith.constant 0 : i32
    return %arg0, %c0_i32 : i32, i32
  }
}

</mosaic_0001>

<bundles_post_ra>
// kernel: tpu_custom_call.1
= control target key start
LH: loop header
LB: loop body
LE: loop exit
PB: predicated region body
PF: predicated region fallthrough
CT: control target
= control target key end

     0   :  { %v95_v2 = vmov 0   ;;  %s154_s0 = inlined_call_operand.vmem [shape: f32[32,49], index: 0, kind: input, shape index: {}]   ;;  %s155_s1 = inlined_call_operand.vmem [shape: f32[32,1], index: 1, kind: input, shape index: {}]   ;;  %s156_s2 = inlined_call_operand.hbm [shape: f32[32,49], index: 2, kind: output, shape index: {}]  }
   0x1   :  { %v18_v0 = vld [vmem:[%s155_s1 + $0x10] sm:$0xff]  ;;  %v16_v1 = vld [vmem:[%s155_s1] sm:$0xff]  ;;  %70 = vset.pattern.permute.xlu1 %v95_v2  ;;  %69 = vset.pattern.permute.xlu0 %v95_v2 }
   0x2   :  { %32 = vperm.xlu1 %70, %v18_v0   ;;  %22 = vperm.xlu0 %69, %v16_v1  }
   0x3   :  { %7 = vsyncpa [#allocation3], 0  ;;  %v19_v3 = vld [vmem:[%s155_s1 + $0x18] sm:$0xff]  ;;  %v17_v4 = vld [vmem:[%s155_s1 + $0x8] sm:$0xff]  ;;  %vm44_vm0 = vcmask 400384   ;;  %s96_s21 = smov [#allocation2]  }
   0x4   :  { %v14_v5 = vld [vmem:[%s154_s0 + $0x10] sm:$0xff]  ;;  %v12_v6 = vld [vmem:[%s154_s0] sm:$0xff]  ;;  %s54_s22 = sshll.u32 %s96_s21, 4  ;;  %v15_v11 = vld [vmem:[%s154_s0 + $0x18] sm:$0xff]  ;;  %s55_s22 = int_to_ptr.vmem [resolvable:$true] %s54_s22 }
   0x5   :  { %v13_v12 = vld [vmem:[%s154_s0 + $0x8] sm:$0xff]  ;;  %s71_s26 = scalar_lea.vmem %s55_s22, 512  ;;  %p76_p1 = scmp.lt.s32.totalorder %s55_s22, %s55_s22 }
   0x6   :  { %37 = vperm.xlu1 %70, %v19_v3   ;;  %27 = vperm.xlu0 %69, %v17_v4   ;;  %p72_p0 = scmp.ne.s32.totalorder %s55_s22, %s71_s26  ;;  %p77_p2 = scmp.lt.s32.totalorder %s71_s26, %s71_s26 }
   0x8   :  { %p78_p3 = por %p77_p2, %p76_p1 }
   0xa   :  { %p79_p4 = pnand %p78_p3, %p72_p0 }
  0x81   :  { %v33_v7 = vpop.permute.xlu1 %32  ;;  %v23_v8 = vpop.permute.xlu0 %22 }
  0x82   :  { %v42_v9 = vmul.f32 %v33_v7, %v14_v5  ;;  %v40_v10 = vmul.f32 %v23_v8, %v12_v6 }
  0x84   :  { %47 = vst.msk [vmem:[#allocation2 + $0x10] sm:$0xff] %vm44_vm0, %v42_v9  ;;  %45 = vst.msk [vmem:[#allocation2] sm:$0xff] %vm44_vm0, %v40_v10 }
  0x85   :  { %v38_v13 = vpop.permute.xlu1 %37  ;;  %v28_v14 = vpop.permute.xlu0 %27 }
  0x86   :  { %v43_v15 = vmul.f32 %v38_v13, %v15_v11  ;;  %v41_v16 = vmul.f32 %v28_v14, %v13_v12 }
  0x88   :  { %48 = vst.msk [vmem:[#allocation2 + $0x18] sm:$0xff] %vm44_vm0, %v43_v15  ;;  %46 = vst.msk [vmem:[#allocation2 + $0x8] sm:$0xff] %vm44_vm0, %v41_v16 }
  0x89   :  { %82 = shalt.err (!%p79_p4)
}
  0x8a   :  { %s83_s28 = scalar_lea.hbm %s156_s2, 512 }
  0x8b   :  { %p84_p5 = scmp.ne.s32.totalorder %s156_s2, %s83_s28  ;;  %p87_p6 = scmp.lt.u32.totalorder %s83_s28, %s156_s2 }
  0x8d   :  { %p89_p7 = pnand %p87_p6, %p84_p5 }
  0x8f   :  { %92 = shalt.err (!%p89_p7)
}
  0x90   :  { %s97_s5 = smov 128   ;;  %s98_s6 = smov 8  }
  0x91   :  { %60 = dma.vmem_to_hbm [thread:$0]  %s55_s22, 512, %s156_s2, [#allocation3], %s97_s5, %s97_s5, %s98_s6  }
  0x92   :  { %93 = dma.done.wait [#allocation3], 512  }
  0x93   :  { %94 = vsyncadd [#allocation3], 4294966784 }
  0x94   :  { %64 = vsyncpa [#allocation3], 1 }

</bundles_post_ra>
